<compile_context>
chip_gen: v6e
topology: v6e:2x2x1
jax: 0.10.0
libtpu: 0.0.40
codegen_flags: <defaults>
</compile_context>

<pallas_src>
import functools
import numpy as np
import jax
import jax.numpy as jnp
from jax.experimental import pallas as pl
from jax.experimental.pallas import tpu as pltpu


# ------------------------------ Pallas kernel -------------------------------
def _patch_embed_kernel(p_ref, w_ref, prm_ref, o_ref, *, use_norm):
    """Fused patch projection (+ bias) and optional LayerNorm.

    p_ref:   (TILE_M, K)  im2col'd patches, bf16 (K = Cin * p * p)
    w_ref:   (K, E)       conv weight, flattened & transposed, bf16
    prm_ref: (3, E) f32   [bias; gamma; beta]   (or (1, E) = [bias] w/o norm)
    o_ref:   (TILE_M, E)  output tokens (E multiple of 128 -> lane-dense)
    """
    # Single MXU matmul on native bf16 operands, f32 accumulator.
    y = jax.lax.dot_general(p_ref[...], w_ref[...], (((1,), (0,)), ((), ())),
                            preferred_element_type=jnp.float32)
    y = y + prm_ref[0:1, :]                       # conv bias (f32)
    if use_norm:
        # nn.LayerNorm(embed_dim): eps=1e-5, biased variance, all math in f32.
        mu = jnp.mean(y, axis=-1, keepdims=True)
        yc = y - mu
        var = jnp.mean(yc * yc, axis=-1, keepdims=True)
        y = yc * jax.lax.rsqrt(var + 1e-5) * prm_ref[1:2, :] + prm_ref[2:3, :]
    o_ref[...] = y.astype(o_ref.dtype)


# ------------------------------ wrapper --------------------------------------
def _round_up(a, m):
    return ((a + m - 1) // m) * m


def patch_embed_pallas(x, conv_w, conv_b, gamma=None, beta=None, *, patch_size):
    """x: (B, Cin, H, W) -> (B, Ho*Wo, E), matching PatchEmbed.forward."""
    B, Cin, H, W = x.shape
    p = patch_size
    assert H % p == 0 and W % p == 0, "image size must match the model"
    Ho, Wo = H // p, W // p
    E = conv_w.shape[0]
    K = Cin * p * p
    rows = B * Ho * Wo
    out_dtype = x.dtype

    # bf16 operands for the MXU: halves HBM traffic of a memory-bound kernel.
    xb = x.astype(jnp.bfloat16)
    # Patchify for a stride==kernel conv (patch element order (c, kh, kw)
    # matches PyTorch Conv2d weight flattening).  This is pure layout
    # plumbing; allow_input_fusion below lets XLA fuse it into the
    # pallas_call input DMA so no im2col buffer hits HBM.
    patches = (xb.reshape(B, Cin, Ho, p, Wo, p)
                 .transpose(0, 2, 4, 1, 3, 5)          # (B, Ho, Wo, Cin, p, p)
                 .reshape(rows, K))
    w_t = conv_w.reshape(E, K).T.astype(jnp.bfloat16)  # (K, E), matmul-ready

    use_norm = gamma is not None
    if use_norm:
        params = jnp.stack([conv_b.astype(jnp.float32),
                            gamma.astype(jnp.float32),
                            beta.astype(jnp.float32)], axis=0)        # (3, E)
    else:
        params = conv_b.astype(jnp.float32).reshape(1, E)             # (1, E)
    p_rows = params.shape[0]

    # Row tiling.  Big tiles amortize per-step overhead; >= 2 steps once
    # rows >= 256 keeps both v7x TensorCores busy; pad rows to a tile
    # multiple instead of degrading to tiny divisor tiles.
    if rows < 256:
        tile_m = rows                                  # single step
    else:
        tile_m = min(2048, _round_up(pl.cdiv(rows, 2), 8))
    rows_padded = _round_up(rows, tile_m)
    if rows_padded != rows:
        patches = jnp.pad(patches, ((0, rows_padded - rows), (0, 0)))
    grid = (rows_padded // tile_m,)

    kernel = functools.partial(_patch_embed_kernel, use_norm=use_norm)

    out = pl.pallas_call(
        kernel,
        out_shape=jax.ShapeDtypeStruct((rows_padded, E), out_dtype),
        grid_spec=pltpu.PrefetchScalarGridSpec(
            num_scalar_prefetch=0,
            grid=grid,
            in_specs=[
                pl.BlockSpec((tile_m, K), lambda i: (i, 0)),   # patches (bf16)
                pl.BlockSpec((K, E), lambda i: (0, 0)),        # weight (resident)
                pl.BlockSpec((p_rows, E), lambda i: (0, 0)),   # bias[,gamma,beta]
            ],
            out_specs=pl.BlockSpec((tile_m, E), lambda i: (i, 0)),
        ),
        compiler_params=pltpu.CompilerParams(
            dimension_semantics=("parallel",),     # shards row tiles across TCs
            allow_input_fusion=[True, False, False],
            vmem_limit_bytes=32 * 1024 * 1024,
        ),
    )(patches, w_t, params)

    return out[:rows].reshape(B, Ho * Wo, E)


# --------------------------- pure-JAX reference -------------------------------
def patch_embed_reference(x, conv_w, conv_b, gamma=None, beta=None, *, patch_size):
    p = patch_size
    y = jax.lax.conv_general_dilated(
        x, conv_w, window_strides=(p, p), padding='VALID',
        dimension_numbers=('NCHW', 'OIHW', 'NCHW'),
        precision=jax.lax.Precision.HIGHEST)
    y = y + conv_b.reshape(1, -1, 1, 1)
    B, E, Ho, Wo = y.shape
    y = y.reshape(B, E, Ho * Wo).transpose(0, 2, 1)      # flatten(2).transpose(1, 2)
    if gamma is not None:
        mu = jnp.mean(y, axis=-1, keepdims=True)
        var = jnp.mean((y - mu) ** 2, axis=-1, keepdims=True)
        y = (y - mu) / jnp.sqrt(var + 1e-5) * gamma + beta
    return y


# ----------------------------------- main -------------------------------------
if __name__ == "__main__":
    # Small shapes consistent with the module: img_size=32, patch_size=4,
    # in_chans=3, embed_dim=128 (lane-dense), batch=2.
    B, Cin, IMG, P, E = 2, 3, 32, 4, 128

    key = jax.random.PRNGKey(0)
    k0, k1, k2, k3, k4 = jax.random.split(key, 5)
    x = jax.random.normal(k0, (B, Cin, IMG, IMG), jnp.float32)
    conv_w = (0.05 * jax.random.normal(k1, (E, Cin, P, P))).astype(jnp.float32)
    conv_b = (0.02 * jax.random.normal(k2, (E,))).astype(jnp.float32)
    gamma = (1.0 + 0.1 * jax.random.normal(k3, (E,))).astype(jnp.float32)
    beta = (0.05 * jax.random.normal(k4, (E,))).astype(jnp.float32)

    # norm_layer = nn.LayerNorm (Swin patch_norm=True path)
    fwd_norm = jax.jit(functools.partial(patch_embed_pallas, patch_size=P))
    out = jax.block_until_ready(fwd_norm(x, conv_w, conv_b, gamma, beta))
    ref = jax.block_until_ready(
        patch_embed_reference(x, conv_w, conv_b, gamma, beta, patch_size=P))

    assert out.shape == (B, (IMG // P) * (IMG // P), E)
    assert bool(jnp.all(jnp.isfinite(out)))
    # bf16 operands + f32 accumulation vs f32 HIGHEST reference.
    np.testing.assert_allclose(np.asarray(out), np.asarray(ref), rtol=2e-2, atol=2e-2)

    # norm_layer = None (module default) — gamma/beta operands dropped entirely.
    fwd_nonorm = jax.jit(functools.partial(patch_embed_pallas, patch_size=P))
    out2 = jax.block_until_ready(fwd_nonorm(x, conv_w, conv_b))
    ref2 = jax.block_until_ready(
        patch_embed_reference(x, conv_w, conv_b, patch_size=P))
    np.testing.assert_allclose(np.asarray(out2), np.asarray(ref2), rtol=2e-2, atol=2e-2)

    print("KERNEL_OK")
</pallas_src>

<mosaic_0001>
module attributes {stable_mosaic.version = 11 : i64} {
  func.func @_patch_embed_kernel(%arg0: i32, %arg1: memref<128x48xbf16, #tpu.memory_space<vmem>>, %arg2: memref<48x128xbf16, #tpu.memory_space<vmem>>, %arg3: memref<3x128xf32, #tpu.memory_space<vmem>>, %arg4: memref<128x128xf32, #tpu.memory_space<vmem>>) attributes {dimension_semantics = [#tpu.dimension_semantics<parallel>], iteration_bounds = array<i64: 1>, scalar_prefetch = 0 : i64, scratch_operands = 0 : i64, tpu.core_type = #tpu.core_type<tc>, window_params = [{transform_indices = @transform_0, window_bounds = array<i64: 128, 48>}, {pipeline_mode = #tpu.pipeline_mode<synchronous>, transform_indices = @transform_1, window_bounds = array<i64: 48, 128>}, {pipeline_mode = #tpu.pipeline_mode<synchronous>, transform_indices = @transform_2, window_bounds = array<i64: 3, 128>}, {transform_indices = @transform_3, window_bounds = array<i64: 128, 128>}]} {
    %c0 = arith.constant 0 : index
    %c0_0 = arith.constant 0 : index
    %0 = vector.load %arg1[%c0, %c0_0] : memref<128x48xbf16, #tpu.memory_space<vmem>>, vector<128x48xbf16>
    %c0_1 = arith.constant 0 : index
    %c0_2 = arith.constant 0 : index
    %1 = vector.load %arg2[%c0_1, %c0_2] : memref<48x128xbf16, #tpu.memory_space<vmem>>, vector<48x128xbf16>
    %cst = arith.constant dense<0.000000e+00> : vector<128x128xf32>
    %2 = tpu.matmul %0, %1, %cst {dimension_numbers = #tpu.dot_dimension_numbers<[1], [0], [0], [1], [0, 0, 1, 1], [], []>} : vector<128x48xbf16>, vector<48x128xbf16>, vector<128x128xf32> -> vector<128x128xf32>
    %c0_3 = arith.constant 0 : index
    %c0_4 = arith.constant 0 : index
    %3 = vector.load %arg3[%c0_3, %c0_4] : memref<3x128xf32, #tpu.memory_space<vmem>>, vector<1x128xf32>
    %4 = vector.broadcast %3 : vector<1x128xf32> to vector<128x128xf32>
    %5 = arith.addf %2, %4 : vector<128x128xf32>
    %cst_5 = arith.constant dense<0.000000e+00> : vector<128xf32>
    %6 = vector.multi_reduction <add>, %5, %cst_5 [1] : vector<128x128xf32> to vector<128xf32>
    %7 = vector.shape_cast %6 : vector<128xf32> to vector<128x1xf32>
    %cst_6 = arith.constant 1.280000e+02 : f32
    %8 = vector.broadcast %cst_6 : f32 to vector<128x1xf32>
    %9 = arith.divf %7, %8 : vector<128x1xf32>
    %10 = vector.broadcast %9 : vector<128x1xf32> to vector<128x128xf32>
    %11 = arith.subf %5, %10 : vector<128x128xf32>
    %12 = arith.mulf %11, %11 : vector<128x128xf32>
    %cst_7 = arith.constant dense<0.000000e+00> : vector<128xf32>
    %13 = vector.multi_reduction <add>, %12, %cst_7 [1] : vector<128x128xf32> to vector<128xf32>
    %14 = vector.shape_cast %13 : vector<128xf32> to vector<128x1xf32>
    %cst_8 = arith.constant 1.280000e+02 : f32
    %15 = vector.broadcast %cst_8 : f32 to vector<128x1xf32>
    %16 = arith.divf %14, %15 : vector<128x1xf32>
    %cst_9 = arith.constant 9.99999974E-6 : f32
    %17 = vector.broadcast %cst_9 : f32 to vector<128x1xf32>
    %18 = arith.addf %16, %17 : vector<128x1xf32>
    %19 = math.rsqrt %18 : vector<128x1xf32>
    %20 = vector.broadcast %19 : vector<128x1xf32> to vector<128x128xf32>
    %21 = arith.mulf %11, %20 : vector<128x128xf32>
    %c1 = arith.constant 1 : index
    %c0_10 = arith.constant 0 : index
    %22 = vector.load %arg3[%c1, %c0_10] : memref<3x128xf32, #tpu.memory_space<vmem>>, vector<1x128xf32>
    %23 = vector.broadcast %22 : vector<1x128xf32> to vector<128x128xf32>
    %24 = arith.mulf %21, %23 : vector<128x128xf32>
    %c2 = arith.constant 2 : index
    %c0_11 = arith.constant 0 : index
    %25 = vector.load %arg3[%c2, %c0_11] : memref<3x128xf32, #tpu.memory_space<vmem>>, vector<1x128xf32>
    %26 = vector.broadcast %25 : vector<1x128xf32> to vector<128x128xf32>
    %27 = arith.addf %24, %26 : vector<128x128xf32>
    %c0_12 = arith.constant 0 : index
    %c0_13 = arith.constant 0 : index
    %28 = vector.load %arg4[%c0_12, %c0_13] : memref<128x128xf32, #tpu.memory_space<vmem>>, vector<128x128xf32>
    tpu.vector_store %arg4[%c0_12, %c0_13], %27 {strides = array<i32>} : memref<128x128xf32, #tpu.memory_space<vmem>>, vector<128x128xf32>,
    return
  }
  func.func @transform_0(%arg0: i32) -> (i32, i32) {
    %c0_i32 = arith.constant 0 : i32
    %c0_i32_0 = arith.constant 0 : i32
    return %arg0, %c0_i32 : i32, i32
  }
  func.func @transform_1(%arg0: i32) -> (i32, i32) {
    %c0_i32 = arith.constant 0 : i32
    %c0_i32_0 = arith.constant 0 : i32
    %c0_i32_1 = arith.constant 0 : i32
    return %c0_i32, %c0_i32_0 : i32, i32
  }
  func.func @transform_2(%arg0: i32) -> (i32, i32) {
    %c0_i32 = arith.constant 0 : i32
    %c0_i32_0 = arith.constant 0 : i32
    %c0_i32_1 = arith.constant 0 : i32
    return %c0_i32, %c0_i32_0 : i32, i32
  }
  func.func @transform_3(%arg0: i32) -> (i32, i32) {
    %c0_i32 = arith.constant 0 : i32
    %c0_i32_0 = arith.constant 0 : i32
    return %arg0, %c0_i32 : i32, i32
  }
}

</mosaic_0001>

<bundles_post_ra>
// kernel: patch_embed_pallas.1
= control target key start
LH: loop header
LB: loop body
LE: loop exit
PB: predicated region body
PF: predicated region fallthrough
CT: control target
= control target key end

     0   :  { %vm101_vm0 = vcmask 392192   ;;  %s823_s0 = inlined_call_operand.vmem [shape: bf16[128,48], index: 0, kind: input, shape index: {}]   ;;  %s824_s1 = inlined_call_operand.vmem [shape: bf16[48,128], index: 1, kind: input, shape index: {}]   ;;  %s825_s2 = inlined_call_operand.vmem [shape: f32[3,128], index: 2, kind: input, shape index: {}]   ;;  %s826_s3 = inlined_call_operand.hbm [shape: f32[128,128], index: 3, kind: output, shape index: {}]  }
   0x1   :  { %v538_v0 = vld [vmem:[%s824_s1 + $0x10] sm:$0xff]   ;;  %v539_v1 = vld [vmem:[%s824_s1 + $0x8] sm:$0xff]   ;;  %v540_v2 = vld [vmem:[%s824_s1] sm:$0xff]  }
   0x2   :  { %507 = vmatprep.subr.bf16.mxu0 %v538_v0  ;;  %529 = vmatprep.subr.bf16.mxu1 %v538_v0  ;;  %v541_v3 = vld [vmem:[%s823_s0] sm:$0xff]   ;;  %v543_v5 = vld [vmem:[%s823_s0 + $0x8] sm:$0xff]   ;;  %v545_v7 = vld [vmem:[%s823_s0 + $0x10] sm:$0xff]  }
   0x3   :  { %508 = vmatpush3.bf16.msra.mxu0 %v538_v0  ;;  %532 = vmatpush3.bf16.msra.mxu1 %v538_v0  ;;  %v542_v4 = vld [vmem:[%s823_s0 + $0x20] sm:$0xff]   ;;  %v544_v6 = vld [vmem:[%s823_s0 + $0x28] sm:$0xff]   ;;  %v547_v8 = vld [vmem:[%s823_s0 + $0x30] sm:$0xff]  }
   0x4   :  { %509 = vmatprep.subr.bf16.mxu0 %v539_v1  ;;  %530 = vmatprep.subr.bf16.mxu1 %v539_v1 }
   0x5   :  { %513 = vmatprep.mubr.msk.bf16.mxu0 %vm101_vm0, %v541_v3  ;;  %521 = vmatprep.mubr.msk.bf16.mxu1 %vm101_vm0, %v542_v4 }
   0x7   :  { %510 = vmatpush3.bf16.msra.mxu0 %v539_v1  ;;  %533 = vmatpush3.bf16.msra.mxu1 %v539_v1 }
   0x8   :  { %511 = vmatprep.subr.bf16.mxu0 %v540_v2  ;;  %531 = vmatprep.subr.bf16.mxu1 %v540_v2 }
   0xb   :  { %512 = vmatpush3.bf16.msra.mxu0 %v540_v2  ;;  %534 = vmatpush3.bf16.msra.mxu1 %v540_v2 }
   0xc   :  { %8 = vsyncpa [#allocation3], 0  ;;  %v546_v9 = vld [vmem:[%s823_s0 + $0x18] sm:$0xff]   ;;  %v474_v11 = vld [vmem:[%s825_s2] ss:$0 sm:$0xff] }
   0xd   :  { %v548_v10 = vld [vmem:[%s823_s0 + $0x38] sm:$0xff]  }
   0xe   :  { %514 = vmatmul.mubr.msk.bf16.vlgmr.msra.gmra.mxu0 %vm101_vm0, %v543_v5  ;;  %522 = vmatmul.mubr.msk.bf16.vlgmr.msra.gmra.mxu1 %vm101_vm0, %v544_v6 }
   0xf   :  { %517 = vmatprep.mubr.msk.bf16.mxu0 %vm101_vm0, %v545_v7  ;;  %525 = vmatprep.mubr.msk.bf16.mxu1 %vm101_vm0, %v547_v8 }
  0x16   :  { %518 = vmatmul.mubr.msk.bf16.gmra.mxu0 %vm101_vm0, %v546_v9  ;;  %526 = vmatmul.mubr.msk.bf16.gmra.mxu1 %vm101_vm0, %v548_v10 }
  0xce   :  { %v515_v12 = vpop.f32.mrf.mxu0  ;;  %v523_v13 = vpop.f32.mrf.mxu1 }
  0xcf   :  { %v169_v14 = vadd.f32 %v515_v12, %v474_v11  ;;  %v201_v15 = vadd.f32 %v523_v13, %v474_v11 }
  0xd0   :  { %v160_v16 = vpop.f32.mrf.mxu0  ;;  %v192_v17 = vpop.f32.mrf.mxu1 }
  0xd1   :  { %243 = vadd.xlane.f32.xlu0 %v201_v15  ;;  %227 = vadd.xlane.f32.xlu1 %v169_v14  ;;  %v161_v20 = vadd.f32 %v474_v11, %v160_v16  ;;  %v193_v25 = vadd.f32 %v474_v11, %v192_v17 }
  0xd2   :  { %v516_v18 = vpop.f32.mrf.mxu0  ;;  %v524_v19 = vpop.f32.mrf.mxu1 }
  0xd3   :  { %v172_v21 = vadd.f32 %v516_v18, %v474_v11  ;;  %v204_v26 = vadd.f32 %v524_v19, %v474_v11 }
  0xd4   :  { %v163_v22 = vpop.f32.mrf.mxu0  ;;  %v195_v23 = vpop.f32.mrf.mxu1 }
  0xd5   :  { %229 = vadd.xlane.f32.xlu1 %v172_v21  ;;  %223 = vadd.xlane.f32.xlu0 %v161_v20  ;;  %v164_v29 = vadd.f32 %v474_v11, %v163_v22  ;;  %v196_v30 = vadd.f32 %v474_v11, %v195_v23 }
  0xd6   :  { %v519_v24 = vpop.f32.mrf.mxu0  ;;  %v527_v28 = vpop.f32.mrf.mxu1 }
  0xd7   :  { %v185_v33 = vadd.f32 %v519_v24, %v474_v11  ;;  %v685_v42 = vadd.f32 %v527_v28, %v474_v11 }
  0xd8   :  { %v176_v27 = vpop.f32.mrf.mxu0  ;;  %v208_v32 = vpop.f32.mrf.mxu1 }
  0xd9   :  { %245 = vadd.xlane.f32.xlu1 %v204_v26  ;;  %239 = vadd.xlane.f32.xlu0 %v193_v25  ;;  %v673_v37 = vadd.f32 %v474_v11, %v176_v27  ;;  %v679_v40 = vadd.f32 %v474_v11, %v208_v32 }
  0xda   :  { %v520_v31 = vpop.f32.mrf.mxu0  ;;  %v528_v36 = vpop.f32.mrf.mxu1 }
  0xdb   :  { %v670_v34 = vadd.f32 %v520_v31, %v474_v11  ;;  %v687_v43 = vadd.f32 %v528_v36, %v474_v11 }
  0xdc   :  { %v179_v35 = vpop.f32.mrf.mxu0  ;;  %v211_v39 = vpop.f32.mrf.mxu1 }
  0xdd   :  { %241 = vadd.xlane.f32.xlu1 %v196_v30  ;;  %225 = vadd.xlane.f32.xlu0 %v164_v29  ;;  %v675_v38 = vadd.f32 %v474_v11, %v179_v35  ;;  %v681_v41 = vadd.f32 %v474_v11, %v211_v39 }
  0xe1   :  { %237 = vadd.xlane.f32.xlu1 %v670_v34  ;;  %235 = vadd.xlane.f32.xlu0 %v185_v33 }
  0xe5   :  { %233 = vadd.xlane.f32.xlu1 %v675_v38  ;;  %231 = vadd.xlane.f32.xlu0 %v673_v37 }
  0xe9   :  { %249 = vadd.xlane.f32.xlu1 %v681_v41  ;;  %247 = vadd.xlane.f32.xlu0 %v679_v40 }
  0xed   :  { %253 = vadd.xlane.f32.xlu1 %v687_v43  ;;  %251 = vadd.xlane.f32.xlu0 %v685_v42 }
 0x15a   :  { %v244_v44 = vpop.xlane.xlu0 %243  ;;  %v228_v45 = vpop.xlane.xlu1 %227 }
 0x15b   :  { %v266_v46 = vmul.f32 0.0078125, %v244_v44  ;;  %v258_v47 = vmul.f32 0.0078125, %v228_v45 }
 0x15d   :  { %v691_v48 = vsub.f32 %v169_v14, %v258_v47  ;;  %v693_v51 = vsub.f32 %v201_v15, %v266_v46 }
 0x15e   :  { %v230_v49 = vpop.xlane.xlu1 %229  ;;  %v224_v50 = vpop.xlane.xlu0 %223 }
 0x15f   :  { %v259_v52 = vmul.f32 0.0078125, %v230_v49  ;;  %v256_v53 = vmul.f32 0.0078125, %v224_v50  ;;  %v290_v54 = vmul.f32 %v691_v48, %v691_v48  ;;  %v298_v62 = vmul.f32 %v693_v51, %v693_v51 }
 0x161   :  { %v697_v55 = vsub.f32 %v172_v21, %v259_v52  ;;  %308 = vadd.xlane.f32.xlu0 %v290_v54  ;;  %v699_v56 = vsub.f32 %v161_v20, %v256_v53 }
 0x162   :  { %v246_v57 = vpop.xlane.xlu1 %245  ;;  %v240_v58 = vpop.xlane.xlu0 %239 }
 0x163   :  { %v267_v59 = vmul.f32 0.0078125, %v246_v57  ;;  %v264_v60 = vmul.f32 0.0078125, %v240_v58  ;;  %v291_v61 = vmul.f32 %v697_v55, %v697_v55  ;;  %v288_v2 = vmul.f32 %v699_v56, %v699_v56 }
 0x165   :  { %v705_v63 = vsub.f32 %v204_v26, %v267_v59  ;;  %310 = vadd.xlane.f32.xlu1 %v291_v61  ;;  %324 = vadd.xlane.f32.xlu0 %v298_v62  ;;  %v709_v3 = vsub.f32 %v193_v25, %v264_v60 }
 0x166   :  { %v242_v0 = vpop.xlane.xlu1 %241  ;;  %v226_v1 = vpop.xlane.xlu0 %225 }
 0x167   :  { %v265_v4 = vmul.f32 0.0078125, %v242_v0  ;;  %v257_v5 = vmul.f32 0.0078125, %v226_v1  ;;  %v299_v6 = vmul.f32 %v705_v63, %v705_v63  ;;  %v296_v13 = vmul.f32 %v709_v3, %v709_v3 }
 0x169   :  { %v713_v7 = vsub.f32 %v164_v29, %v257_v5  ;;  %326 = vadd.xlane.f32.xlu1 %v299_v6  ;;  %304 = vadd.xlane.f32.xlu0 %v288_v2  ;;  %v715_v8 = vsub.f32 %v196_v30, %v265_v4 }
 0x16a   :  { %v238_v9 = vpop.xlane.xlu1 %237  ;;  %v236_v10 = vpop.xlane.xlu0 %235 }
 0x16b   :  { %v263_v11 = vmul.f32 0.0078125, %v238_v9  ;;  %v262_v12 = vmul.f32 0.0078125, %v236_v10  ;;  %v289_v14 = vmul.f32 %v713_v7, %v713_v7  ;;  %v297_v18 = vmul.f32 %v715_v8, %v715_v8 }
 0x16d   :  { %v721_v15 = vsub.f32 %v185_v33, %v262_v12  ;;  %320 = vadd.xlane.f32.xlu0 %v296_v13  ;;  %306 = vadd.xlane.f32.xlu1 %v289_v14  ;;  %v726_v19 = vsub.f32 %v670_v34, %v263_v11  ;;  %v765_v14 = vld [vmem:[%s825_s2 + $0x1] ss:$0 sm:$0xff] }
 0x16e   :  { %v234_v16 = vpop.xlane.xlu1 %233  ;;  %v232_v17 = vpop.xlane.xlu0 %231 }
 0x16f   :  { %v261_v20 = vmul.f32 0.0078125, %v234_v16  ;;  %v260_v21 = vmul.f32 0.0078125, %v232_v17  ;;  %v294_v22 = vmul.f32 %v721_v15, %v721_v15  ;;  %v295_v29 = vmul.f32 %v726_v19, %v726_v19 }
 0x171   :  { %v731_v23 = vsub.f32 %v673_v37, %v260_v21  ;;  %322 = vadd.xlane.f32.xlu1 %v297_v18  ;;  %316 = vadd.xlane.f32.xlu0 %v294_v22  ;;  %v734_v24 = vsub.f32 %v675_v38, %v261_v20  ;;  %v771_v20 = vld [vmem:[%s825_s2 + $0x2] ss:$0 sm:$0xff]  ;;  %s603_s2 = smov [#allocation2]  }
 0x172   :  { %v250_v25 = vpop.xlane.xlu1 %249  ;;  %v248_v26 = vpop.xlane.xlu0 %247  ;;  %s463_s11 = sshll.u32 %s603_s2, 4  ;;  %s464_s11 = int_to_ptr.vmem [resolvable:$true] %s463_s11 }
 0x173   :  { %v269_v27 = vmul.f32 0.0078125, %v250_v25  ;;  %v268_v28 = vmul.f32 0.0078125, %v248_v26  ;;  %v292_v30 = vmul.f32 %v731_v23, %v731_v23  ;;  %v293_v34 = vmul.f32 %v734_v24, %v734_v24  ;;  %s581_s12 = scalar_lea.vmem %s464_s11, 2048  ;;  %p586_p1 = scmp.lt.s32.totalorder %s464_s11, %s464_s11 }
 0x174   :  { %p582_p0 = scmp.ne.s32.totalorder %s464_s11, %s581_s12  ;;  %p587_p2 = scmp.lt.s32.totalorder %s581_s12, %s581_s12 }
 0x175   :  { %v741_v31 = vsub.f32 %v679_v40, %v268_v28  ;;  %318 = vadd.xlane.f32.xlu1 %v295_v29  ;;  %312 = vadd.xlane.f32.xlu0 %v292_v30  ;;  %v746_v35 = vsub.f32 %v681_v41, %v269_v27 }
 0x176   :  { %v254_v32 = vpop.xlane.xlu1 %253  ;;  %v252_v33 = vpop.xlane.xlu0 %251  ;;  %p588_p3 = por %p587_p2, %p586_p1 }
 0x177   :  { %v271_v36 = vmul.f32 0.0078125, %v254_v32  ;;  %v270_v37 = vmul.f32 0.0078125, %v252_v33  ;;  %v300_v38 = vmul.f32 %v741_v31, %v741_v31  ;;  %v301_v44 = vmul.f32 %v746_v35, %v746_v35 }
 0x178   :  { %p589_p4 = pnand %p588_p3, %p582_p0 }
 0x179   :  { %v751_v39 = vsub.f32 %v685_v42, %v270_v37  ;;  %314 = vadd.xlane.f32.xlu1 %v293_v34  ;;  %328 = vadd.xlane.f32.xlu0 %v300_v38  ;;  %v754_v40 = vsub.f32 %v687_v43, %v271_v36 }
 0x17b   :  { %v302_v41 = vmul.f32 %v751_v39, %v751_v39  ;;  %v303_v45 = vmul.f32 %v754_v40, %v754_v40 }
 0x17d   :  { %330 = vadd.xlane.f32.xlu1 %v301_v44  ;;  %332 = vadd.xlane.f32.xlu0 %v302_v41 }
 0x181   :  { %334 = vadd.xlane.f32.xlu1 %v303_v45 }
 0x1ea   :  { %v309_v46 = vpop.xlane.xlu0 %308 }
 0x1eb   :  { %v338_v42 = vmul.f32 0.0078125, %v309_v46 }
 0x1ed   :  { %v354_v47 = vadd.f32 1e-05, %v338_v42 }
 0x1ee   :  { %v311_v49 = vpop.xlane.xlu1 %310  ;;  %v325_v50 = vpop.xlane.xlu0 %324 }
 0x1ef   :  { %549 = vrsqrt.f32 %v354_v47  ;;  %v339_v43 = vmul.f32 0.0078125, %v311_v49  ;;  %v346_v52 = vmul.f32 0.0078125, %v325_v50 }
 0x1f1   :  { %v355_v53 = vadd.f32 1e-05, %v339_v43  ;;  %v362_v54 = vadd.f32 1e-05, %v346_v52 }
 0x1f2   :  { %v327_v57 = vpop.xlane.xlu1 %326  ;;  %v305_v58 = vpop.xlane.xlu0 %304 }
 0x1f3   :  { %551 = vrsqrt.f32 %v355_v53  ;;  %v347_v59 = vmul.f32 0.0078125, %v327_v57  ;;  %v336_v60 = vmul.f32 0.0078125, %v305_v58 }
 0x1f4   :  { %553 = vrsqrt.f32 %v362_v54 }
 0x1f5   :  { %v363_v61 = vadd.f32 1e-05, %v347_v59  ;;  %v352_v62 = vadd.f32 1e-05, %v336_v60 }
 0x1f6   :  { %v307_v0 = vpop.xlane.xlu1 %306  ;;  %v321_v1 = vpop.xlane.xlu0 %320 }
 0x1f7   :  { %555 = vrsqrt.f32 %v363_v61  ;;  %v337_v2 = vmul.f32 0.0078125, %v307_v0  ;;  %v344_v4 = vmul.f32 0.0078125, %v321_v1 }
 0x1f8   :  { %557 = vrsqrt.f32 %v352_v62 }
 0x1f9   :  { %v353_v5 = vadd.f32 1e-05, %v337_v2  ;;  %v360_v6 = vadd.f32 1e-05, %v344_v4 }
 0x1fa   :  { %v323_v9 = vpop.xlane.xlu1 %322  ;;  %v317_v10 = vpop.xlane.xlu0 %316 }
 0x1fb   :  { %559 = vrsqrt.f32 %v353_v5  ;;  %v345_v11 = vmul.f32 0.0078125, %v323_v9  ;;  %v342_v12 = vmul.f32 0.0078125, %v317_v10 }
 0x1fc   :  { %v550_v13 = vpop.eup %549  ;;  %561 = vrsqrt.f32 %v360_v6 }
 0x1fd   :  { %v386_v16 = vmul.f32 %v550_v13, %v691_v48  ;;  %v361_v17 = vadd.f32 1e-05, %v345_v11  ;;  %v358_v18 = vadd.f32 1e-05, %v342_v12 }
 0x1fe   :  { %v319_v21 = vpop.xlane.xlu1 %318  ;;  %v313_v22 = vpop.xlane.xlu0 %312 }
 0x1ff   :  { %v407_v25 = vmul.f32 %v765_v14, %v386_v16  ;;  %563 = vrsqrt.f32 %v361_v17  ;;  %v343_v26 = vmul.f32 0.0078125, %v319_v21  ;;  %v340_v27 = vmul.f32 0.0078125, %v313_v22 }
 0x200   :  { %v552_v28 = vpop.eup %551  ;;  %565 = vrsqrt.f32 %v358_v18 }
 0x201   :  { %v554_v29 = vpop.eup %553  ;;  %v428_v30 = vadd.f32 %v771_v20, %v407_v25  ;;  %v387_v48 = vmul.f32 %v552_v28, %v697_v55  ;;  %v359_v32 = vadd.f32 1e-05, %v343_v26  ;;  %v356_v33 = vadd.f32 1e-05, %v340_v27 }
 0x202   :  { %v394_v34 = vmul.f32 %v554_v29, %v693_v51  ;;  %v315_v36 = vpop.xlane.xlu1 %314  ;;  %v329_v37 = vpop.xlane.xlu0 %328 }
 0x203   :  { %444 = vst [vmem:[#allocation2 + $0x10] sm:$0xff] %v428_v30  ;;  %v408_v38 = vmul.f32 %v765_v14, %v387_v48  ;;  %567 = vrsqrt.f32 %v359_v32  ;;  %v341_v44 = vmul.f32 0.0078125, %v315_v36  ;;  %v348_v41 = vmul.f32 0.0078125, %v329_v37 }
 0x204   :  { %v556_v45 = vpop.eup %555  ;;  %v415_v46 = vmul.f32 %v765_v14, %v394_v34  ;;  %569 = vrsqrt.f32 %v356_v33 }
 0x205   :  { %v558_v42 = vpop.eup %557  ;;  %v429_v47 = vadd.f32 %v771_v20, %v408_v38  ;;  %v395_v55 = vmul.f32 %v556_v45, %v705_v63  ;;  %v357_v49 = vadd.f32 1e-05, %v341_v44  ;;  %v364_v50 = vadd.f32 1e-05, %v348_v41 }
 0x206   :  { %v436_v51 = vadd.f32 %v771_v20, %v415_v46  ;;  %v384_v43 = vmul.f32 %v558_v42, %v699_v56  ;;  %v331_v52 = vpop.xlane.xlu1 %330  ;;  %v333_v53 = vpop.xlane.xlu0 %332 }
 0x207   :  { %445 = vst [vmem:[#allocation2 + $0x18] sm:$0xff] %v429_v47  ;;  %v416_v54 = vmul.f32 %v765_v14, %v395_v55  ;;  %571 = vrsqrt.f32 %v357_v49  ;;  %v349_v57 = vmul.f32 0.0078125, %v331_v52  ;;  %v350_v58 = vmul.f32 0.0078125, %v333_v53 }
 0x208   :  { %v560_v59 = vpop.eup %559  ;;  %452 = vst [vmem:[#allocation2 + $0x50] sm:$0xff] %v436_v51  ;;  %v405_v60 = vmul.f32 %v765_v14, %v384_v43  ;;  %573 = vrsqrt.f32 %v364_v50 }
 0x209   :  { %v562_v63 = vpop.eup %561  ;;  %v437_v61 = vadd.f32 %v771_v20, %v416_v54  ;;  %v385_v62 = vmul.f32 %v560_v59, %v713_v7  ;;  %v365_v0 = vadd.f32 1e-05, %v349_v57  ;;  %v366_v56 = vadd.f32 1e-05, %v350_v58 }
 0x20a   :  { %v426_v1 = vadd.f32 %v771_v20, %v405_v60  ;;  %v392_v2 = vmul.f32 %v562_v63, %v709_v3  ;;  %v335_v4 = vpop.xlane.xlu1 %334 }
 0x20b   :  { %453 = vst [vmem:[#allocation2 + $0x58] sm:$0xff] %v437_v61  ;;  %v406_v5 = vmul.f32 %v765_v14, %v385_v62  ;;  %575 = vrsqrt.f32 %v365_v0  ;;  %v351_v6 = vmul.f32 0.0078125, %v335_v4 }
 0x20c   :  { %v564_v9 = vpop.eup %563  ;;  %442 = vst [vmem:[#allocation2] sm:$0xff] %v426_v1  ;;  %v413_v10 = vmul.f32 %v765_v14, %v392_v2  ;;  %577 = vrsqrt.f32 %v366_v56 }
 0x20d   :  { %v566_v11 = vpop.eup %565  ;;  %v427_v7 = vadd.f32 %v771_v20, %v406_v5  ;;  %v393_v12 = vmul.f32 %v564_v9, %v715_v8  ;;  %v367_v13 = vadd.f32 1e-05, %v351_v6 }
 0x20e   :  { %v434_v16 = vadd.f32 %v771_v20, %v413_v10  ;;  %v390_v3 = vmul.f32 %v566_v11, %v721_v15 }
 0x20f   :  { %443 = vst [vmem:[#allocation2 + $0x8] sm:$0xff] %v427_v7  ;;  %v414_v17 = vmul.f32 %v765_v14, %v393_v12  ;;  %579 = vrsqrt.f32 %v367_v13 }
 0x210   :  { %v568_v18 = vpop.eup %567  ;;  %450 = vst [vmem:[#allocation2 + $0x40] sm:$0xff] %v434_v16  ;;  %v411_v21 = vmul.f32 %v765_v14, %v390_v3 }
 0x211   :  { %v570_v22 = vpop.eup %569  ;;  %v435_v25 = vadd.f32 %v771_v20, %v414_v17  ;;  %v391_v26 = vmul.f32 %v568_v18, %v726_v19 }
 0x212   :  { %v432_v8 = vadd.f32 %v771_v20, %v411_v21  ;;  %v388_v27 = vmul.f32 %v570_v22, %v731_v23 }
 0x213   :  { %451 = vst [vmem:[#allocation2 + $0x48] sm:$0xff] %v435_v25  ;;  %v412_v15 = vmul.f32 %v765_v14, %v391_v26 }
 0x214   :  { %v572_v28 = vpop.eup %571  ;;  %448 = vst [vmem:[#allocation2 + $0x30] sm:$0xff] %v432_v8  ;;  %v409_v29 = vmul.f32 %v765_v14, %v388_v27 }
 0x215   :  { %v574_v30 = vpop.eup %573  ;;  %v433_v48 = vadd.f32 %v771_v20, %v412_v15  ;;  %v389_v32 = vmul.f32 %v572_v28, %v734_v24 }
 0x216   :  { %v430_v33 = vadd.f32 %v771_v20, %v409_v29  ;;  %v396_v19 = vmul.f32 %v574_v30, %v741_v31 }
 0x217   :  { %449 = vst [vmem:[#allocation2 + $0x38] sm:$0xff] %v433_v48  ;;  %v410_v34 = vmul.f32 %v765_v14, %v389_v32 }
 0x218   :  { %v576_v23 = vpop.eup %575  ;;  %446 = vst [vmem:[#allocation2 + $0x20] sm:$0xff] %v430_v33  ;;  %v417_v36 = vmul.f32 %v765_v14, %v396_v19 }
 0x219   :  { %v578_v37 = vpop.eup %577  ;;  %v431_v38 = vadd.f32 %v771_v20, %v410_v34  ;;  %v397_v44 = vmul.f32 %v576_v23, %v746_v35 }
 0x21a   :  { %v438_v41 = vadd.f32 %v771_v20, %v417_v36  ;;  %v398_v24 = vmul.f32 %v578_v37, %v751_v39 }
 0x21b   :  { %447 = vst [vmem:[#allocation2 + $0x28] sm:$0xff] %v431_v38  ;;  %v418_v45 = vmul.f32 %v765_v14, %v397_v44 }
 0x21c   :  { %v580_v31 = vpop.eup %579  ;;  %454 = vst [vmem:[#allocation2 + $0x60] sm:$0xff] %v438_v41  ;;  %v419_v46 = vmul.f32 %v765_v14, %v398_v24 }
 0x21d   :  { %v439_v42 = vadd.f32 %v771_v20, %v418_v45  ;;  %v399_v47 = vmul.f32 %v580_v31, %v754_v40 }
 0x21e   :  { %v440_v55 = vadd.f32 %v771_v20, %v419_v46 }
 0x21f   :  { %455 = vst [vmem:[#allocation2 + $0x68] sm:$0xff] %v439_v42  ;;  %v420_v35 = vmul.f32 %v765_v14, %v399_v47 }
 0x220   :  { %456 = vst [vmem:[#allocation2 + $0x70] sm:$0xff] %v440_v55 }
 0x221   :  { %v441_v39 = vadd.f32 %v771_v20, %v420_v35 }
 0x223   :  { %457 = vst [vmem:[#allocation2 + $0x78] sm:$0xff] %v441_v39 }
 0x224   :  { %592 = shalt.err (!%p589_p4)
}
 0x225   :  { %s604_s13 = smov 128   ;;  %s605_s14 = smov 8  }
 0x226   :  { %469 = dma.vmem_to_hbm [thread:$0]  %s464_s11, 2048, %s826_s3, [#allocation3], %s604_s13, %s604_s13, %s605_s14  }
 0x227   :  { %601 = dma.done.wait [#allocation3], 2048  }
 0x228   :  { %602 = vsyncadd [#allocation3], 4294965248 }
 0x229   :  { %473 = vsyncpa [#allocation3], 1 }

</bundles_post_ra>
